<compile_context>
chip_gen: v7x
topology: tpu7x:2x2x1
jax: 0.10.0
libtpu: 0.0.40
codegen_flags: <defaults>
</compile_context>

<pallas_src>
import functools

import jax
import jax.numpy as jnp
from jax import lax
from jax.experimental import pallas as pl
from jax.experimental.pallas import tpu as pltpu


# ----------------------------------------------------------------------------- helpers
def _round_up(x: int, m: int) -> int:
    return (x + m - 1) // m * m


def topk_mask(scores, k: float):
    """Binary mask keeping the top-k fraction of scores (k == 1.0 -> all ones)."""
    if k >= 1.0:
        return jnp.ones_like(scores)
    # TODO(synk): exact tie-breaking of the original (deprecated) topk_mask is unspecified.
    n = scores.size
    keep = max(int(round(n * k)), 1)
    thresh = jax.lax.top_k(scores.reshape(-1), keep)[0][-1]
    return (scores >= thresh).astype(scores.dtype)


def _sigmoid_eup(x):
    """sigmoid(x) as a single EUP tanh (avoids exp + exact divide on the VPU)."""
    return 0.5 * jnp.tanh(0.5 * x) + 0.5


# ----------------------------------------------------------------------------- kernel
def _complete_layer_kernel(inp_part_ref, init_row_ref, w_vals_t_ref, out_ref, *, its: int):
    """Recurrent hot-loop, fully VMEM-resident.

    inp_part_ref : (B_tile, HO_pad) f32   loop-invariant inp @ w_inp.T (+ bias), padded
    init_row_ref : (1, HO_pad)      f32   values0 @ w_vals.T (first-iteration matvec), padded
    w_vals_t_ref : (HO_pad, HO_pad) bf16/f32 recurrent weights w[:, :H+O].T, zero-padded rows
    out_ref      : (B_tile, OUT_pad) f32  final values (only the first OUT_pad lanes are written back)
    """
    inp_part = inp_part_ref[...]                       # f32, reused every iteration

    # Iteration 1: the initial state is a single broadcast row, so its recurrent matmul
    # collapses to the precomputed (1, HO) row -> no MXU work here.
    values = _sigmoid_eup(inp_part + init_row_ref[...])

    n_rec = its - 1
    if n_rec > 0:
        w_vals_t = w_vals_t_ref[...]                   # resident weights (bf16 feed)
        mxu_dtype = w_vals_t.dtype

        def one_step(v):
            pre = jnp.dot(v.astype(mxu_dtype), w_vals_t,
                          preferred_element_type=jnp.float32) + inp_part
            return _sigmoid_eup(pre)

        if n_rec <= 8:                                 # short: fully unrolled
            for _ in range(n_rec):
                values = one_step(values)
        else:                                          # long: keep code size / vreg pressure bounded
            values = lax.fori_loop(0, n_rec, lambda _, v: one_step(v), values, unroll=2)

    # Lane-dense (multiple of 128) unmasked store of only the lanes the caller keeps.
    out_ref[...] = values[:, :out_ref.shape[1]].astype(out_ref.dtype)


# ----------------------------------------------------------------------------- wrapper
def complete_layer_forward(inp, values, weights, *, output_size, scores=None,
                           scores_k: float = 1.0, bias=None, its: int = 2,
                           batch_tile: int = 512, mxu_dtype=jnp.bfloat16):
    """Pallas forward pass of CompleteLayer.

    inp:     (B, input_size)
    values:  (1, hidden_size + output_size)
    weights: (hidden_size + output_size, input_size + hidden_size + output_size)
    scores:  optional, same shape as weights (only applied when scores_k < 1.0)
    bias:    optional (1, hidden_size + output_size)   -> use_bias=True path
    mxu_dtype: dtype fed to the MXU for the recurrent matmul (bf16 default, f32 for exactness)
    """
    batch, input_size = inp.shape
    ho = values.shape[1]                       # hidden_size + output_size
    assert weights.shape == (ho, input_size + ho)
    assert 0 < output_size <= ho

    values_f32 = values.astype(jnp.float32)
    if its <= 0:                               # degenerate: no iterations -> initial values
        return jnp.broadcast_to(values_f32, (batch, ho))[:, :output_size]

    # --- weight preparation outside the kernel (done once by XLA) -------------
    w = weights.astype(jnp.float32)
    if scores is not None and scores_k < 1.0:
        w = w * topk_mask(scores.astype(jnp.float32), scores_k)
    # scores_k == 1.0 -> mask is all ones: drop it entirely (no extra DMA, no VPU mul).

    w_vals = w[:, :ho]                         # (ho, ho)   recurrent block
    w_inp = w[:, ho:]                          # (ho, I)    input block

    # Loop-invariant input contribution (+bias) and the first-iteration matvec, in XLA.
    inp_part = jnp.dot(inp.astype(jnp.float32), w_inp.T,
                       preferred_element_type=jnp.float32)            # (B, ho)
    if bias is not None:
        inp_part = inp_part + bias.reshape(1, ho).astype(jnp.float32)
    init_row = jnp.dot(values_f32, w_vals.T,
                       preferred_element_type=jnp.float32)            # (1, ho)

    # --- pad everything to hardware tiles -------------------------------------
    ho_pad = _round_up(ho, 128)
    out_pad = min(_round_up(output_size, 128), ho_pad)                # shrunken writeback
    # >=2 grid steps whenever the batch allows (keeps both v7x TCs busy), capped by batch_tile.
    b_tile = min(_round_up(max(batch_tile, 8), 8),
                 max(8, _round_up((batch + 1) // 2, 8)))
    b_pad = _round_up(_round_up(batch, 8), b_tile)

    inp_part_p = jnp.zeros((b_pad, ho_pad), jnp.float32).at[:batch, :ho].set(inp_part)
    init_row_p = jnp.zeros((1, ho_pad), jnp.float32).at[:, :ho].set(init_row)
    # Zero padded ROWS are required so padded value lanes (0.5 after iter 1) never feed real outputs.
    w_vals_t_p = jnp.zeros((ho_pad, ho_pad), jnp.float32).at[:ho, :ho].set(w_vals.T)
    w_vals_t_p = w_vals_t_p.astype(mxu_dtype)

    grid = (b_pad // b_tile,)
    kernel = functools.partial(_complete_layer_kernel, its=its)

    def _make_call(single_buffer_weights: bool):
        w_spec_kwargs = {}
        if single_buffer_weights:
            # Constant index_map -> a second buffer for the resident weights is pure waste.
            w_spec_kwargs = dict(pipeline_mode=pl.Buffered(1))
        n_w_buf = 1 if single_buffer_weights else 2

        itemsize = jnp.dtype(mxu_dtype).itemsize
        vmem_needed = (
            ho_pad * ho_pad * itemsize * n_w_buf       # resident recurrent weights
            + 2 * b_tile * ho_pad * 4                  # inp_part double buffer
            + 2 * b_tile * out_pad * 4                 # output double buffer
            + 2 * ho_pad * 4                           # init row
            + 2 * b_tile * ho_pad * 4                  # in-kernel live values / headroom
        )
        vmem_limit = int(min(max(vmem_needed * 1.5, 16 << 20), 64 << 20))

        return pl.pallas_call(
            kernel,
            out_shape=jax.ShapeDtypeStruct((b_pad, out_pad), jnp.float32),
            grid_spec=pltpu.PrefetchScalarGridSpec(
                num_scalar_prefetch=0,
                grid=grid,
                in_specs=[
                    pl.BlockSpec((b_tile, ho_pad), lambda b: (b, 0)),              # activations stream
                    pl.BlockSpec((1, ho_pad), lambda b: (0, 0)),                   # init row (resident)
                    pl.BlockSpec((ho_pad, ho_pad), lambda b: (0, 0),               # weights resident
                                 **w_spec_kwargs),
                ],
                out_specs=pl.BlockSpec((b_tile, out_pad), lambda b: (b, 0)),
            ),
            compiler_params=pltpu.CompilerParams(
                dimension_semantics=("parallel",),     # shards batch tiles across TCs on v7x
                vmem_limit_bytes=vmem_limit,
            ),
        )

    try:
        out_p = _make_call(True)(inp_part_p, init_row_p, w_vals_t_p)
    except Exception:
        # Fallback if single-buffered (Buffered(1)) resident weights are rejected by this runtime.
        out_p = _make_call(False)(inp_part_p, init_row_p, w_vals_t_p)

    return out_p[:batch, :output_size]


# ----------------------------------------------------------------------------- reference
def complete_layer_reference(inp, values, weights, *, output_size, scores=None,
                             scores_k: float = 1.0, bias=None, its: int = 2):
    """Pure-JAX reference mirroring the PyTorch module verbatim."""
    batch = inp.shape[0]
    w = weights
    if scores is not None:
        w = w * topk_mask(scores, scores_k)
    vals = jnp.broadcast_to(values, (batch, values.shape[1]))
    for _ in range(its):
        x = jnp.concatenate([vals, inp], axis=1)
        pre = x @ w.T
        if bias is not None:
            pre = pre + bias
        vals = jax.nn.sigmoid(pre)
    return vals[:, :output_size]


# ----------------------------------------------------------------------------- demo / check
if __name__ == "__main__":
    input_size, hidden_size, output_size = 16, 32, 8
    ho = hidden_size + output_size                     # 40
    units = input_size + ho                            # 56
    batch, its = 4, 2

    key = jax.random.PRNGKey(0)
    k_inp, k_vals, k_w, k_b = jax.random.split(key, 4)
    inp = jax.random.normal(k_inp, (batch, input_size), dtype=jnp.float32)
    values = jax.random.normal(k_vals, (1, ho), dtype=jnp.float32)      # RandomNormal()
    weights = jax.random.normal(k_w, (ho, units), dtype=jnp.float32)    # RandomNormal()
    scores = jnp.ones((ho, units), dtype=jnp.float32)                   # Ones(), scores_k=1.0
    bias = jax.random.normal(k_b, (1, ho), dtype=jnp.float32)

    ref = complete_layer_reference(inp, values, weights, output_size=output_size,
                                   scores=scores, scores_k=1.0, its=its)
    ref_b = complete_layer_reference(inp, values, weights, output_size=output_size,
                                     scores=scores, scores_k=1.0, bias=bias, its=its)

    # f32 MXU path: tight check against the reference (default module config, no bias).
    out_f32 = complete_layer_forward(inp, values, weights, output_size=output_size,
                                     scores=scores, scores_k=1.0, its=its,
                                     mxu_dtype=jnp.float32)
    out_f32 = jax.block_until_ready(out_f32)
    assert out_f32.shape == (batch, output_size)
    assert jnp.allclose(out_f32, ref, atol=1e-4, rtol=1e-4), "f32 path mismatch vs reference"

    # bf16 MXU feed (default / fast path): looser tolerance due to operand quantization.
    out_bf16 = complete_layer_forward(inp, values, weights, output_size=output_size,
                                      scores=scores, scores_k=1.0, its=its)
    out_bf16 = jax.block_until_ready(out_bf16)
    assert jnp.allclose(out_bf16, ref, atol=5e-2, rtol=5e-2), "bf16 path mismatch vs reference"

    # use_bias=True path (bias folded into the loop-invariant input contribution).
    out_bias = complete_layer_forward(inp, values, weights, output_size=output_size,
                                      scores=scores, scores_k=1.0, bias=bias, its=its,
                                      mxu_dtype=jnp.float32)
    out_bias = jax.block_until_ready(out_bias)
    assert jnp.allclose(out_bias, ref_b, atol=1e-4, rtol=1e-4), "bias path mismatch vs reference"

    print("KERNEL_OK")
</pallas_src>

<mosaic_0001>
module attributes {stable_mosaic.version = 11 : i64} {
  func.func @_complete_layer_kernel(%arg0: i32, %arg1: memref<8x128xf32, #tpu.memory_space<vmem>>, %arg2: memref<1x128xf32, #tpu.memory_space<vmem>>, %arg3: memref<128x128xf32, #tpu.memory_space<vmem>>, %arg4: memref<8x128xf32, #tpu.memory_space<vmem>>) attributes {dimension_semantics = [#tpu.dimension_semantics<parallel>], iteration_bounds = array<i64: 1>, scalar_prefetch = 0 : i64, scratch_operands = 0 : i64, tpu.core_type = #tpu.core_type<tc>, window_params = [{transform_indices = @transform_0, window_bounds = array<i64: 8, 128>}, {pipeline_mode = #tpu.pipeline_mode<synchronous>, transform_indices = @transform_1, window_bounds = array<i64: 1, 128>}, {pipeline_mode = #tpu.pipeline_mode<synchronous>, transform_indices = @transform_2, window_bounds = array<i64: 128, 128>}, {transform_indices = @transform_3, window_bounds = array<i64: 8, 128>}]} {
    %c0 = arith.constant 0 : index
    %c0_0 = arith.constant 0 : index
    %0 = vector.load %arg1[%c0, %c0_0] : memref<8x128xf32, #tpu.memory_space<vmem>>, vector<8x128xf32>
    %c0_1 = arith.constant 0 : index
    %c0_2 = arith.constant 0 : index
    %1 = vector.load %arg2[%c0_1, %c0_2] : memref<1x128xf32, #tpu.memory_space<vmem>>, vector<1x128xf32>
    %2 = vector.broadcast %1 : vector<1x128xf32> to vector<8x128xf32>
    %3 = arith.addf %0, %2 : vector<8x128xf32>
    %cst = arith.constant 5.000000e-01 : f32
    %4 = vector.broadcast %cst : f32 to vector<8x128xf32>
    %5 = arith.mulf %4, %3 : vector<8x128xf32>
    %6 = math.tanh %5 : vector<8x128xf32>
    %cst_3 = arith.constant 5.000000e-01 : f32
    %7 = vector.broadcast %cst_3 : f32 to vector<8x128xf32>
    %8 = arith.mulf %7, %6 : vector<8x128xf32>
    %cst_4 = arith.constant 5.000000e-01 : f32
    %9 = vector.broadcast %cst_4 : f32 to vector<8x128xf32>
    %10 = arith.addf %8, %9 : vector<8x128xf32>
    %c0_5 = arith.constant 0 : index
    %c0_6 = arith.constant 0 : index
    %11 = vector.load %arg3[%c0_5, %c0_6] : memref<128x128xf32, #tpu.memory_space<vmem>>, vector<128x128xf32>
    %cst_7 = arith.constant dense<0.000000e+00> : vector<8x128xf32>
    %12 = tpu.matmul %10, %11, %cst_7 {dimension_numbers = #tpu.dot_dimension_numbers<[1], [0], [0], [1], [0, 0, 1, 1], [], []>} : vector<8x128xf32>, vector<128x128xf32>, vector<8x128xf32> -> vector<8x128xf32>
    %13 = arith.addf %12, %0 : vector<8x128xf32>
    %cst_8 = arith.constant 5.000000e-01 : f32
    %14 = vector.broadcast %cst_8 : f32 to vector<8x128xf32>
    %15 = arith.mulf %14, %13 : vector<8x128xf32>
    %16 = math.tanh %15 : vector<8x128xf32>
    %cst_9 = arith.constant 5.000000e-01 : f32
    %17 = vector.broadcast %cst_9 : f32 to vector<8x128xf32>
    %18 = arith.mulf %17, %16 : vector<8x128xf32>
    %cst_10 = arith.constant 5.000000e-01 : f32
    %19 = vector.broadcast %cst_10 : f32 to vector<8x128xf32>
    %20 = arith.addf %18, %19 : vector<8x128xf32>
    %c0_11 = arith.constant 0 : index
    %c0_12 = arith.constant 0 : index
    %21 = vector.load %arg4[%c0_11, %c0_12] : memref<8x128xf32, #tpu.memory_space<vmem>>, vector<8x128xf32>
    tpu.vector_store %arg4[%c0_11, %c0_12], %20 {strides = array<i32>} : memref<8x128xf32, #tpu.memory_space<vmem>>, vector<8x128xf32>,
    return
  }
  func.func @transform_0(%arg0: i32) -> (i32, i32) {
    %c0_i32 = arith.constant 0 : i32
    %c0_i32_0 = arith.constant 0 : i32
    return %arg0, %c0_i32 : i32, i32
  }
  func.func @transform_1(%arg0: i32) -> (i32, i32) {
    %c0_i32 = arith.constant 0 : i32
    %c0_i32_0 = arith.constant 0 : i32
    %c0_i32_1 = arith.constant 0 : i32
    return %c0_i32, %c0_i32_0 : i32, i32
  }
  func.func @transform_2(%arg0: i32) -> (i32, i32) {
    %c0_i32 = arith.constant 0 : i32
    %c0_i32_0 = arith.constant 0 : i32
    %c0_i32_1 = arith.constant 0 : i32
    return %c0_i32, %c0_i32_0 : i32, i32
  }
  func.func @transform_3(%arg0: i32) -> (i32, i32) {
    %c0_i32 = arith.constant 0 : i32
    %c0_i32_0 = arith.constant 0 : i32
    return %arg0, %c0_i32 : i32, i32
  }
}

module attributes {stable_mosaic.version = 11 : i64} {
  func.func @_complete_layer_kernel(%arg0: i32, %arg1: memref<8x128xf32, #tpu.memory_space<vmem>>, %arg2: memref<1x128xf32, #tpu.memory_space<vmem>>, %arg3: memref<128x128xf32, #tpu.memory_space<vmem>>, %arg4: memref<8x128xf32, #tpu.memory_space<vmem>>) attributes {dimension_semantics = [#tpu.dimension_semantics<parallel>], iteration_bounds = array<i64: 1>, scalar_prefetch = 0 : i64, scratch_operands = 0 : i64, tpu.core_type = #tpu.core_type<tc>, window_params = [{transform_indices = @transform_0, window_bounds = array<i64: 8, 128>}, {pipeline_mode = #tpu.pipeline_mode<synchronous>, transform_indices = @transform_1, window_bounds = array<i64: 1, 128>}, {pipeline_mode = #tpu.pipeline_mode<synchronous>, transform_indices = @transform_2, window_bounds = array<i64: 128, 128>}, {transform_indices = @transform_3, window_bounds = array<i64: 8, 128>}]} {
    %c0 = arith.constant 0 : index
    %c0_0 = arith.constant 0 : index
    %0 = vector.load %arg1[%c0, %c0_0] : memref<8x128xf32, #tpu.memory_space<vmem>>, vector<8x128xf32>
    %c0_1 = arith.constant 0 : index
    %c0_2 = arith.constant 0 : index
    %1 = vector.load %arg2[%c0_1, %c0_2] : memref<1x128xf32, #tpu.memory_space<vmem>>, vector<1x128xf32>
    %2 = vector.broadcast %1 : vector<1x128xf32> to vector<8x128xf32>
    %3 = arith.addf %0, %2 : vector<8x128xf32>
    %cst = arith.constant 5.000000e-01 : f32
    %4 = vector.broadcast %cst : f32 to vector<8x128xf32>
    %5 = arith.mulf %4, %3 : vector<8x128xf32>
    %6 = math.tanh %5 : vector<8x128xf32>
    %cst_3 = arith.constant 5.000000e-01 : f32
    %7 = vector.broadcast %cst_3 : f32 to vector<8x128xf32>
    %8 = arith.mulf %7, %6 : vector<8x128xf32>
    %cst_4 = arith.constant 5.000000e-01 : f32
    %9 = vector.broadcast %cst_4 : f32 to vector<8x128xf32>
    %10 = arith.addf %8, %9 : vector<8x128xf32>
    %c0_5 = arith.constant 0 : index
    %c0_6 = arith.constant 0 : index
    %11 = vector.load %arg3[%c0_5, %c0_6] : memref<128x128xf32, #tpu.memory_space<vmem>>, vector<128x128xf32>
    %cst_7 = arith.constant dense<0.000000e+00> : vector<8x128xf32>
    %12 = tpu.matmul %10, %11, %cst_7 {dimension_numbers = #tpu.dot_dimension_numbers<[1], [0], [0], [1], [0, 0, 1, 1], [], []>} : vector<8x128xf32>, vector<128x128xf32>, vector<8x128xf32> -> vector<8x128xf32>
    %13 = arith.addf %12, %0 : vector<8x128xf32>
    %cst_8 = arith.constant 5.000000e-01 : f32
    %14 = vector.broadcast %cst_8 : f32 to vector<8x128xf32>
    %15 = arith.mulf %14, %13 : vector<8x128xf32>
    %16 = math.tanh %15 : vector<8x128xf32>
    %cst_9 = arith.constant 5.000000e-01 : f32
    %17 = vector.broadcast %cst_9 : f32 to vector<8x128xf32>
    %18 = arith.mulf %17, %16 : vector<8x128xf32>
    %cst_10 = arith.constant 5.000000e-01 : f32
    %19 = vector.broadcast %cst_10 : f32 to vector<8x128xf32>
    %20 = arith.addf %18, %19 : vector<8x128xf32>
    %c0_11 = arith.constant 0 : index
    %c0_12 = arith.constant 0 : index
    %21 = vector.load %arg4[%c0_11, %c0_12] : memref<8x128xf32, #tpu.memory_space<vmem>>, vector<8x128xf32>
    tpu.vector_store %arg4[%c0_11, %c0_12], %20 {strides = array<i32>} : memref<8x128xf32, #tpu.memory_space<vmem>>, vector<8x128xf32>,
    return
  }
  func.func @transform_0(%arg0: i32) -> (i32, i32) {
    %c0_i32 = arith.constant 0 : i32
    %c0_i32_0 = arith.constant 0 : i32
    return %arg0, %c0_i32 : i32, i32
  }
  func.func @transform_1(%arg0: i32) -> (i32, i32) {
    %c0_i32 = arith.constant 0 : i32
    %c0_i32_0 = arith.constant 0 : i32
    %c0_i32_1 = arith.constant 0 : i32
    return %c0_i32, %c0_i32_0 : i32, i32
  }
  func.func @transform_2(%arg0: i32) -> (i32, i32) {
    %c0_i32 = arith.constant 0 : i32
    %c0_i32_0 = arith.constant 0 : i32
    %c0_i32_1 = arith.constant 0 : i32
    return %c0_i32, %c0_i32_0 : i32, i32
  }
  func.func @transform_3(%arg0: i32) -> (i32, i32) {
    %c0_i32 = arith.constant 0 : i32
    %c0_i32_0 = arith.constant 0 : i32
    return %arg0, %c0_i32 : i32, i32
  }
}

</mosaic_0001>

<bundles_post_ra>
// kernel: tpu_custom_call.1
= control target key start
LH: loop header
LB: loop body
LE: loop exit
PB: predicated region body
PF: predicated region fallthrough
CT: control target
= control target key end

     0   :  { %8 = vsyncpa [#allocation3], 0  ;;  %s396_s0 = inlined_call_operand.hbm [shape: f32[8,128], index: 0, kind: input, shape index: {}]   ;;  %s397_s1 = inlined_call_operand.vmem [shape: f32[1,128], index: 1, kind: input, shape index: {}]   ;;  %s398_s2 = inlined_call_operand.hbm [shape: f32[128,128], index: 2, kind: input, shape index: {}]   ;;  %s399_s3 = inlined_call_operand.hbm [shape: f32[8,128], index: 3, kind: output, shape index: {}]  }
   0x1   :  { %9 = vsyncpa [#allocation6], 0 }
   0x2   :  { %10 = vsyncpa [#allocation4], 0  ;;  %s322_s12 = smov [#allocation2]   ;;  %s323_s14 = smov [#allocation5]  }
   0x3   :  { %s17_s13 = sshll.u32 %s322_s12, 4  ;;  %s28_s15 = sshll.u32 %s323_s14, 4  ;;  %s18_s13 = int_to_ptr.vmem [resolvable:$true] %s17_s13  ;;  %s350_s15 = int_to_ptr.vmem [resolvable:$true] %s28_s15 }
   0x4   :  { %s250_s18 = scalar_lea.hbm %s396_s0, 128 }
   0x5   :  { %p251_p0 = scmp.ne.s32.totalorder %s396_s0, %s250_s18  ;;  %p254_p1 = scmp.lt.u32.totalorder %s250_s18, %s396_s0 }
   0x7   :  { %p256_p2 = pnand %p254_p1, %p251_p0 }
   0x9   :  { %259 = shalt.err (!%p256_p2)
}
   0xa   :  { %s260_s23 = scalar_lea.vmem %s18_s13, 128  ;;  %p265_p4 = scmp.lt.s32.totalorder %s18_s13, %s18_s13 }
   0xb   :  { %p261_p3 = scmp.ne.s32.totalorder %s18_s13, %s260_s23  ;;  %p266_p5 = scmp.lt.s32.totalorder %s260_s23, %s260_s23 }
   0xd   :  { %p267_p6 = por %p266_p5, %p265_p4 }
   0xf   :  { %p268_p7 = pnand %p267_p6, %p261_p3 }
  0x11   :  { %271 = shalt.err (!%p268_p7)
}
  0x12   :  { %20 = dma.hbm_to_vmem [thread:$0]  %s396_s0, 128, %s18_s13, [#allocation3]  }
  0x13   :  { %s272_s28 = scalar_lea.hbm %s398_s2, 2048 }
  0x14   :  { %p273_p8 = scmp.ne.s32.totalorder %s398_s2, %s272_s28  ;;  %p276_p9 = scmp.lt.u32.totalorder %s272_s28, %s398_s2 }
  0x16   :  { %p278_p10 = pnand %p276_p9, %p273_p8 }
  0x18   :  { %281 = shalt.err (!%p278_p10)
}
  0x19   :  { %s282_s6 = scalar_lea.vmem %s350_s15, 2048  ;;  %p287_p12 = scmp.lt.s32.totalorder %s350_s15, %s350_s15 }
  0x1a   :  { %p283_p11 = scmp.ne.s32.totalorder %s350_s15, %s282_s6  ;;  %p288_p13 = scmp.lt.s32.totalorder %s282_s6, %s282_s6 }
  0x1c   :  { %p289_p0 = por %p288_p13, %p287_p12 }
  0x1e   :  { %p290_p1 = pnand %p289_p0, %p283_p11 }
  0x20   :  { %293 = shalt.err (!%p290_p1)
}
  0x21   :  { %s324_s0 = smov 128   ;;  %s325_s7 = smov 8  }
  0x22   :  { %34 = dma.hbm_to_vmem [thread:$0]  %s398_s2, 2048, %s350_s15, [#allocation6], %s324_s0, %s324_s0, %s325_s7  }
  0x23   :  { %316 = dma.done.wait [#allocation3], 128  }
  0x24   :  { %317 = vsyncadd [#allocation3], 4294967168 }
  0x25   :  { %318 = dma.done.wait [#allocation6], 2048  }
  0x26   :  { %319 = vsyncadd [#allocation6], 4294965248  ;;  %v326_v0 = vmov 0.0|0.0   ;;  %vm327_vm0 = vmmov 0   ;;  %v328_v1 = vmov 0.0   ;;  %v54_v2 = vld [vmem:[#allocation5] sm:$0xff] }
  0x27   :  { %214 = vmatprep.subr.bf16.mxu0 %v326_v0  ;;  %211 = vmatprep.mubr.msk.f32.mxu0 %vm327_vm0, %v328_v1  ;;  %v55_v3 = vld [vmem:[#allocation5 + $0x8] sm:$0xff]  ;;  %v56_v4 = vld [vmem:[#allocation5 + $0x10] sm:$0xff]  ;;  %v57_v6 = vld [vmem:[#allocation5 + $0x18] sm:$0xff] }
  0x28   :  { %v215_v5 = vpack.c.bf16 %v55_v3, %v54_v2  ;;  %v218_v7 = vpack.c.bf16 %v57_v6, %v56_v4  ;;  %v58_v8 = vld [vmem:[#allocation5 + $0x20] sm:$0xff]  ;;  %v59_v9 = vld [vmem:[#allocation5 + $0x28] sm:$0xff]  ;;  %v41_v10 = vld [vmem:[#allocation2] sm:$0xff] }
  0x29   :  { %v161_v11 = vld [vmem:[%s397_s1] ss:$0 sm:$0xff]  ;;  %v221_v13 = vpack.c.bf16 %v59_v9, %v58_v8  ;;  %v60_v14 = vld [vmem:[#allocation5 + $0x30] sm:$0xff]  ;;  %v62_v18 = vld [vmem:[#allocation5 + $0x40] sm:$0xff]  ;;  %s329_s1 = smov [#allocation7]  }
  0x2a   :  { %216 = vmatpush3.bf16.msra.mxu0 %v215_v5  ;;  %v49_v12 = vadd.f32 %v161_v11, %v41_v10  ;;  %v61_v15 = vld [vmem:[#allocation5 + $0x38] sm:$0xff]  ;;  %v63_v19 = vld [vmem:[#allocation5 + $0x48] sm:$0xff]  ;;  %v64_v21 = vld [vmem:[#allocation5 + $0x50] sm:$0xff]  ;;  %s151_s11 = sshll.u32 %s329_s1, 4  ;;  %s152_s11 = int_to_ptr.vmem [resolvable:$true] %s151_s11 }
  0x2b   :  { %217 = vmatprep.subr.bf16.mxu0 %v326_v0  ;;  %v224_v17 = vpack.c.bf16 %v61_v15, %v60_v14  ;;  %v227_v20 = vpack.c.bf16 %v63_v19, %v62_v18  ;;  %v65_v22 = vld [vmem:[#allocation5 + $0x58] sm:$0xff]  ;;  %v66_v24 = vld [vmem:[#allocation5 + $0x60] sm:$0xff]  ;;  %v67_v25 = vld [vmem:[#allocation5 + $0x68] sm:$0xff]  ;;  %s294_s12 = scalar_lea.vmem %s152_s11, 128  ;;  %p299_p3 = scmp.lt.s32.totalorder %s152_s11, %s152_s11 }
  0x2c   :  { %v50_v16 = vmul.f32 0.5, %v49_v12  ;;  %v230_v23 = vpack.c.bf16 %v65_v22, %v64_v21  ;;  %v233_v27 = vpack.c.bf16 %v67_v25, %v66_v24  ;;  %v68_v28 = vld [vmem:[#allocation5 + $0x70] sm:$0xff]  ;;  %v69_v29 = vld [vmem:[#allocation5 + $0x78] sm:$0xff]  ;;  %p295_p2 = scmp.ne.s32.totalorder %s152_s11, %s294_s12  ;;  %p300_p4 = scmp.lt.s32.totalorder %s294_s12, %s294_s12 }
  0x2d   :  { %v236_v31 = vpack.c.bf16 %v69_v29, %v68_v28 }
  0x2e   :  { %219 = vmatpush3.bf16.msra.mxu0 %v218_v7  ;;  %246 = vtanh.f32 %v50_v16  ;;  %p301_p5 = por %p300_p4, %p299_p3 }
  0x2f   :  { %220 = vmatprep.subr.bf16.mxu0 %v326_v0 }
  0x30   :  { %p302_p6 = pnand %p301_p5, %p295_p2 }
  0x32   :  { %222 = vmatpush3.bf16.msra.mxu0 %v221_v13 }
  0x33   :  { %223 = vmatprep.subr.bf16.mxu0 %v326_v0 }
  0x36   :  { %225 = vmatpush3.bf16.msra.mxu0 %v224_v17 }
  0x37   :  { %226 = vmatprep.subr.bf16.mxu0 %v326_v0 }
  0x38   :  { %v247_v26 = vpop.eup %246 }
  0x39   :  { %v52_v30 = vmul.f32 0.5, %v247_v26 }
  0x3a   :  { %228 = vmatpush3.bf16.msra.mxu0 %v227_v20 }
  0x3b   :  { %229 = vmatprep.subr.bf16.mxu0 %v326_v0  ;;  %v53_v32 = vadd.f32 0.5, %v52_v30 }
  0x3e   :  { %231 = vmatpush3.bf16.msra.mxu0 %v230_v23 }
  0x3f   :  { %232 = vmatprep.subr.bf16.mxu0 %v326_v0 }
  0x42   :  { %234 = vmatpush3.bf16.msra.mxu0 %v233_v27 }
  0x43   :  { %235 = vmatprep.subr.bf16.mxu0 %v326_v0 }
  0x46   :  { %237 = vmatpush3.bf16.msra.mxu0 %v236_v31 }
  0x49   :  { %212 = vmatmul.mubr.f32.vlgmr.msra.gmra.mrb[0].mxu0 %v53_v32 }
 0x11c   :  { %v136_v33 = vpop.f32.mrb[0].mxu0 }
 0x11d   :  { %v137_v34 = vadd.f32 %v136_v33, %v41_v10  ;;  %v213_v35 = vpop.f32.mrb[1].mxu0 }
 0x11f   :  { %v140_v36 = vmul.f32 0.5, %v137_v34 }
 0x121   :  { %248 = vtanh.f32 %v140_v36 }
 0x12b   :  { %v249_v37 = vpop.eup %248 }
 0x12c   :  { %v142_v38 = vmul.f32 0.5, %v249_v37 }
 0x12e   :  { %v143_v39 = vadd.f32 0.5, %v142_v38 }
 0x130   :  { %144 = vst [vmem:[#allocation7] sm:$0xff] %v143_v39 }
 0x131   :  { %305 = shalt.err (!%p302_p6)
}
 0x132   :  { %s306_s15 = scalar_lea.hbm %s399_s3, 128 }
 0x133   :  { %p307_p7 = scmp.ne.s32.totalorder %s399_s3, %s306_s15  ;;  %p310_p8 = scmp.lt.u32.totalorder %s306_s15, %s399_s3 }
 0x135   :  { %p312_p9 = pnand %p310_p8, %p307_p7 }
 0x137   :  { %315 = shalt.err (!%p312_p9)
}
 0x138   :  { %154 = dma.vmem_to_hbm [thread:$0]  %s152_s11, 128, %s399_s3, [#allocation4]  }
 0x139   :  { %320 = dma.done.wait [#allocation4], 128  }
 0x13a   :  { %321 = vsyncadd [#allocation4], 4294967168 }
 0x13b   :  { %158 = vsyncpa [#allocation3], 1 }
 0x13c   :  { %159 = vsyncpa [#allocation6], 1 }
 0x13d   :  { %160 = vsyncpa [#allocation4], 1 }

// kernel: tpu_custom_call.1
= control target key start
LH: loop header
LB: loop body
LE: loop exit
PB: predicated region body
PF: predicated region fallthrough
CT: control target
= control target key end

     0   :  { %8 = vsyncpa [#allocation3], 0  ;;  %s396_s0 = inlined_call_operand.hbm [shape: f32[8,128], index: 0, kind: input, shape index: {}]   ;;  %s397_s1 = inlined_call_operand.vmem [shape: f32[1,128], index: 1, kind: input, shape index: {}]   ;;  %s398_s2 = inlined_call_operand.hbm [shape: f32[128,128], index: 2, kind: input, shape index: {}]   ;;  %s399_s3 = inlined_call_operand.hbm [shape: f32[8,128], index: 3, kind: output, shape index: {}]  }
   0x1   :  { %9 = vsyncpa [#allocation6], 0 }
   0x2   :  { %10 = vsyncpa [#allocation4], 0  ;;  %s322_s12 = smov [#allocation2]   ;;  %s323_s14 = smov [#allocation5]  }
   0x3   :  { %s17_s13 = sshll.u32 %s322_s12, 4  ;;  %s28_s15 = sshll.u32 %s323_s14, 4  ;;  %s18_s13 = int_to_ptr.vmem [resolvable:$true] %s17_s13  ;;  %s350_s15 = int_to_ptr.vmem [resolvable:$true] %s28_s15 }
   0x4   :  { %s250_s18 = scalar_lea.hbm %s396_s0, 128 }
   0x5   :  { %p251_p0 = scmp.ne.s32.totalorder %s396_s0, %s250_s18  ;;  %p254_p1 = scmp.lt.u32.totalorder %s250_s18, %s396_s0 }
   0x7   :  { %p256_p2 = pnand %p254_p1, %p251_p0 }
   0x9   :  { %259 = shalt.err (!%p256_p2)
}
   0xa   :  { %s260_s23 = scalar_lea.vmem %s18_s13, 128  ;;  %p265_p4 = scmp.lt.s32.totalorder %s18_s13, %s18_s13 }
   0xb   :  { %p261_p3 = scmp.ne.s32.totalorder %s18_s13, %s260_s23  ;;  %p266_p5 = scmp.lt.s32.totalorder %s260_s23, %s260_s23 }
   0xd   :  { %p267_p6 = por %p266_p5, %p265_p4 }
   0xf   :  { %p268_p7 = pnand %p267_p6, %p261_p3 }
  0x11   :  { %271 = shalt.err (!%p268_p7)
}
  0x12   :  { %20 = dma.hbm_to_vmem [thread:$0]  %s396_s0, 128, %s18_s13, [#allocation3]  }
  0x13   :  { %s272_s28 = scalar_lea.hbm %s398_s2, 2048 }
  0x14   :  { %p273_p8 = scmp.ne.s32.totalorder %s398_s2, %s272_s28  ;;  %p276_p9 = scmp.lt.u32.totalorder %s272_s28, %s398_s2 }
  0x16   :  { %p278_p10 = pnand %p276_p9, %p273_p8 }
  0x18   :  { %281 = shalt.err (!%p278_p10)
}
  0x19   :  { %s282_s6 = scalar_lea.vmem %s350_s15, 2048  ;;  %p287_p12 = scmp.lt.s32.totalorder %s350_s15, %s350_s15 }
  0x1a   :  { %p283_p11 = scmp.ne.s32.totalorder %s350_s15, %s282_s6  ;;  %p288_p13 = scmp.lt.s32.totalorder %s282_s6, %s282_s6 }
  0x1c   :  { %p289_p0 = por %p288_p13, %p287_p12 }
  0x1e   :  { %p290_p1 = pnand %p289_p0, %p283_p11 }
  0x20   :  { %293 = shalt.err (!%p290_p1)
}
  0x21   :  { %s324_s0 = smov 128   ;;  %s325_s7 = smov 8  }
  0x22   :  { %34 = dma.hbm_to_vmem [thread:$0]  %s398_s2, 2048, %s350_s15, [#allocation6], %s324_s0, %s324_s0, %s325_s7  }
  0x23   :  { %316 = dma.done.wait [#allocation3], 128  }
  0x24   :  { %317 = vsyncadd [#allocation3], 4294967168 }
  0x25   :  { %318 = dma.done.wait [#allocation6], 2048  }
  0x26   :  { %319 = vsyncadd [#allocation6], 4294965248  ;;  %v326_v0 = vmov 0.0|0.0   ;;  %vm327_vm0 = vmmov 0   ;;  %v328_v1 = vmov 0.0   ;;  %v54_v2 = vld [vmem:[#allocation5] sm:$0xff] }
  0x27   :  { %214 = vmatprep.subr.bf16.mxu0 %v326_v0  ;;  %211 = vmatprep.mubr.msk.f32.mxu0 %vm327_vm0, %v328_v1  ;;  %v55_v3 = vld [vmem:[#allocation5 + $0x8] sm:$0xff]  ;;  %v56_v4 = vld [vmem:[#allocation5 + $0x10] sm:$0xff]  ;;  %v57_v6 = vld [vmem:[#allocation5 + $0x18] sm:$0xff] }
  0x28   :  { %v215_v5 = vpack.c.bf16 %v55_v3, %v54_v2  ;;  %v218_v7 = vpack.c.bf16 %v57_v6, %v56_v4  ;;  %v58_v8 = vld [vmem:[#allocation5 + $0x20] sm:$0xff]  ;;  %v59_v9 = vld [vmem:[#allocation5 + $0x28] sm:$0xff]  ;;  %v41_v10 = vld [vmem:[#allocation2] sm:$0xff] }
  0x29   :  { %v161_v11 = vld [vmem:[%s397_s1] ss:$0 sm:$0xff]  ;;  %v221_v13 = vpack.c.bf16 %v59_v9, %v58_v8  ;;  %v60_v14 = vld [vmem:[#allocation5 + $0x30] sm:$0xff]  ;;  %v62_v18 = vld [vmem:[#allocation5 + $0x40] sm:$0xff]  ;;  %s329_s1 = smov [#allocation7]  }
  0x2a   :  { %216 = vmatpush3.bf16.msra.mxu0 %v215_v5  ;;  %v49_v12 = vadd.f32 %v161_v11, %v41_v10  ;;  %v61_v15 = vld [vmem:[#allocation5 + $0x38] sm:$0xff]  ;;  %v63_v19 = vld [vmem:[#allocation5 + $0x48] sm:$0xff]  ;;  %v64_v21 = vld [vmem:[#allocation5 + $0x50] sm:$0xff]  ;;  %s151_s11 = sshll.u32 %s329_s1, 4  ;;  %s152_s11 = int_to_ptr.vmem [resolvable:$true] %s151_s11 }
  0x2b   :  { %217 = vmatprep.subr.bf16.mxu0 %v326_v0  ;;  %v224_v17 = vpack.c.bf16 %v61_v15, %v60_v14  ;;  %v227_v20 = vpack.c.bf16 %v63_v19, %v62_v18  ;;  %v65_v22 = vld [vmem:[#allocation5 + $0x58] sm:$0xff]  ;;  %v66_v24 = vld [vmem:[#allocation5 + $0x60] sm:$0xff]  ;;  %v67_v25 = vld [vmem:[#allocation5 + $0x68] sm:$0xff]  ;;  %s294_s12 = scalar_lea.vmem %s152_s11, 128  ;;  %p299_p3 = scmp.lt.s32.totalorder %s152_s11, %s152_s11 }
  0x2c   :  { %v50_v16 = vmul.f32 0.5, %v49_v12  ;;  %v230_v23 = vpack.c.bf16 %v65_v22, %v64_v21  ;;  %v233_v27 = vpack.c.bf16 %v67_v25, %v66_v24  ;;  %v68_v28 = vld [vmem:[#allocation5 + $0x70] sm:$0xff]  ;;  %v69_v29 = vld [vmem:[#allocation5 + $0x78] sm:$0xff]  ;;  %p295_p2 = scmp.ne.s32.totalorder %s152_s11, %s294_s12  ;;  %p300_p4 = scmp.lt.s32.totalorder %s294_s12, %s294_s12 }
  0x2d   :  { %v236_v31 = vpack.c.bf16 %v69_v29, %v68_v28 }
  0x2e   :  { %219 = vmatpush3.bf16.msra.mxu0 %v218_v7  ;;  %246 = vtanh.f32 %v50_v16  ;;  %p301_p5 = por %p300_p4, %p299_p3 }
  0x2f   :  { %220 = vmatprep.subr.bf16.mxu0 %v326_v0 }
  0x30   :  { %p302_p6 = pnand %p301_p5, %p295_p2 }
  0x32   :  { %222 = vmatpush3.bf16.msra.mxu0 %v221_v13 }
  0x33   :  { %223 = vmatprep.subr.bf16.mxu0 %v326_v0 }
  0x36   :  { %225 = vmatpush3.bf16.msra.mxu0 %v224_v17 }
  0x37   :  { %226 = vmatprep.subr.bf16.mxu0 %v326_v0 }
  0x38   :  { %v247_v26 = vpop.eup %246 }
  0x39   :  { %v52_v30 = vmul.f32 0.5, %v247_v26 }
  0x3a   :  { %228 = vmatpush3.bf16.msra.mxu0 %v227_v20 }
  0x3b   :  { %229 = vmatprep.subr.bf16.mxu0 %v326_v0  ;;  %v53_v32 = vadd.f32 0.5, %v52_v30 }
  0x3e   :  { %231 = vmatpush3.bf16.msra.mxu0 %v230_v23 }
  0x3f   :  { %232 = vmatprep.subr.bf16.mxu0 %v326_v0 }
  0x42   :  { %234 = vmatpush3.bf16.msra.mxu0 %v233_v27 }
  0x43   :  { %235 = vmatprep.subr.bf16.mxu0 %v326_v0 }
  0x46   :  { %237 = vmatpush3.bf16.msra.mxu0 %v236_v31 }
  0x49   :  { %212 = vmatmul.mubr.f32.vlgmr.msra.gmra.mrb[0].mxu0 %v53_v32 }
 0x11c   :  { %v136_v33 = vpop.f32.mrb[0].mxu0 }
 0x11d   :  { %v137_v34 = vadd.f32 %v136_v33, %v41_v10  ;;  %v213_v35 = vpop.f32.mrb[1].mxu0 }
 0x11f   :  { %v140_v36 = vmul.f32 0.5, %v137_v34 }
 0x121   :  { %248 = vtanh.f32 %v140_v36 }
 0x12b   :  { %v249_v37 = vpop.eup %248 }
 0x12c   :  { %v142_v38 = vmul.f32 0.5, %v249_v37 }
 0x12e   :  { %v143_v39 = vadd.f32 0.5, %v142_v38 }
 0x130   :  { %144 = vst [vmem:[#allocation7] sm:$0xff] %v143_v39 }
 0x131   :  { %305 = shalt.err (!%p302_p6)
}
 0x132   :  { %s306_s15 = scalar_lea.hbm %s399_s3, 128 }
 0x133   :  { %p307_p7 = scmp.ne.s32.totalorder %s399_s3, %s306_s15  ;;  %p310_p8 = scmp.lt.u32.totalorder %s306_s15, %s399_s3 }
 0x135   :  { %p312_p9 = pnand %p310_p8, %p307_p7 }
 0x137   :  { %315 = shalt.err (!%p312_p9)
}
 0x138   :  { %154 = dma.vmem_to_hbm [thread:$0]  %s152_s11, 128, %s399_s3, [#allocation4]  }
 0x139   :  { %320 = dma.done.wait [#allocation4], 128  }
 0x13a   :  { %321 = vsyncadd [#allocation4], 4294967168 }
 0x13b   :  { %158 = vsyncpa [#allocation3], 1 }
 0x13c   :  { %159 = vsyncpa [#allocation6], 1 }
 0x13d   :  { %160 = vsyncpa [#allocation4], 1 }

</bundles_post_ra>
